<compile_context>
chip_gen: v5e
topology: v5e:2x2
jax: 0.10.0
libtpu: 0.0.40
codegen_flags: <defaults>
</compile_context>

<pallas_src>
import jax
import jax.numpy as jnp
from jax.experimental import pallas as pl
from jax.experimental.pallas import tpu as pltpu


def _round_up(a: int, m: int) -> int:
    return (a + m - 1) // m * m


def _lane_pad(n: int) -> int:      # last-dim lane padding
    return _round_up(max(n, 1), 128)


def _sub_pad(n: int) -> int:       # second-to-last-dim sublane padding
    return _round_up(max(n, 1), 8)


def _physical_vmem_bytes() -> int:
    try:
        return int(pltpu.get_tpu_info().vmem_capacity_bytes)
    except Exception:
        return 64 * 1024 * 1024    # v7x-safe default


def _vmem_budget():
    """(tile_budget_bytes, vmem_limit_bytes) sized from the chip's physical VMEM."""
    phys = _physical_vmem_bytes()
    vmem_limit = max(min(phys - 16 * 1024 * 1024, 100 * 1024 * 1024),
                     32 * 1024 * 1024)
    tile_budget = (vmem_limit * 3) // 4
    return tile_budget, vmem_limit


def _interp_matrix(in_size: int, out_size: int):
    """(out_size, in_size) row-stochastic 1-D linear-interp matrix with half-pixel
    centers (torch bilinear, align_corners=False, antialias=False)."""
    scale = in_size / out_size
    out_idx = jnp.arange(out_size, dtype=jnp.float32)
    src = jnp.maximum((out_idx + 0.5) * scale - 0.5, 0.0)
    i0 = jnp.minimum(jnp.floor(src).astype(jnp.int32), in_size - 1)
    i1 = jnp.minimum(i0 + 1, in_size - 1)
    lam1 = src - i0.astype(jnp.float32)
    lam0 = 1.0 - lam1
    rows = jnp.arange(out_size)
    m = jnp.zeros((out_size, in_size), dtype=jnp.float32)
    m = m.at[rows, i0].add(lam0)
    m = m.at[rows, i1].add(lam1)   # i0 == i1 at the border still sums to 1
    return m


def _kron_resize_kernel(x_ref, k_ref, o_ref):
    # x_ref: (TB, H_in*W_in)              lane-dense input tile
    # k_ref: (H_in*W_in, H_out*W_out)     bf16 fused interp matrix (grid-invariant)
    # o_ref: (TB, H_out*W_out)            lane-dense output slab
    x = x_ref[...].astype(jnp.bfloat16)
    o_ref[...] = jnp.dot(x, k_ref[...],
                         preferred_element_type=jnp.float32).astype(o_ref.dtype)


def _two_pass_resize_kernel(x_ref, wwt_ref, wht_ref, o_ref):
    # Fallback for images whose fused kron matrix would not fit in VMEM.
    # x_ref:   (TB, H_in, W_in)
    # wwt_ref: (W_in, W_out) bf16   (Ww^T)
    # wht_ref: (H_in, H_out) bf16   (Wh^T)
    # o_ref:   (TB, H_out*W_out)
    tb, h_in, w_in = x_ref.shape
    w_out = wwt_ref.shape[1]
    h_out = wht_ref.shape[1]
    x = x_ref[...].astype(jnp.bfloat16)
    # W pass: one flattened MXU matmul (M = TB*H_in), not a batched einsum.
    t = jnp.dot(x.reshape(tb * h_in, w_in), wwt_ref[...],
                preferred_element_type=jnp.float32)
    t = t.reshape(tb, h_in, w_out).astype(jnp.bfloat16)
    # H pass: XLU transpose, then one flattened matmul (M = TB*W_out).
    t = jnp.swapaxes(t, 1, 2).reshape(tb * w_out, h_in)
    u = jnp.dot(t, wht_ref[...], preferred_element_type=jnp.float32)
    u = jnp.swapaxes(u.reshape(tb, w_out, h_out), 1, 2)
    o_ref[...] = u.reshape(tb, h_out * w_out).astype(o_ref.dtype)


def _choose_tile_batch(b: int, per_img_bytes: int, fixed_bytes: int,
                       tile_budget: int) -> int:
    avail = max(tile_budget - fixed_bytes, 8 * per_img_bytes)
    tb = avail // max(per_img_bytes, 1)
    tb = max(8, min(1024, (tb // 8) * 8))
    tb = min(tb, _round_up(b, 8))
    # Keep >= 2 grid steps when the batch allows it so both v7x TensorCores get work.
    if b >= 16:
        tb = min(tb, _round_up(-(-b // 2), 8))
    return tb


def size_adjust(x, target_size):
    """Pallas equivalent of SizeAdjust.forward: bilinear resize of an NCHW input."""
    if isinstance(target_size, int):
        target_size = (target_size, target_size)
    h_out, w_out = target_size
    n, c, h_in, w_in = x.shape
    b = n * c
    isz = jnp.dtype(x.dtype).itemsize
    tile_budget, vmem_limit = _vmem_budget()

    wh = _interp_matrix(h_in, h_out)   # (H_out, H_in) f32
    ww = _interp_matrix(w_in, w_out)   # (W_out, W_in) f32

    k_in, k_out = h_in * w_in, h_out * w_out
    use_kron = k_in * k_out * 2 <= 4 * 1024 * 1024

    if use_kron:
        # Fused matrix: K[ih*W_in+iw, oh*W_out+ow] = Wh[oh,ih] * Ww[ow,iw]  (= kron(Wh,Ww)^T)
        kmat = jnp.einsum("oh,pw->hwop", wh, ww).reshape(k_in, k_out).astype(jnp.bfloat16)

        per_img = (2 * _lane_pad(k_in) * isz       # input block (double-buffered)
                   + 2 * _lane_pad(k_out) * isz    # output block (double-buffered)
                   + 2 * _lane_pad(k_in)           # bf16 cast of x
                   + 4 * _lane_pad(k_out))         # f32 matmul result before cast
        fixed = 2 * _sub_pad(k_in) * _lane_pad(k_out) * 2   # K matrix (both buffers)
        tb = _choose_tile_batch(b, per_img, fixed, tile_budget)
        b_pad = _round_up(b, tb)

        xb = x.reshape(b, k_in)
        if b_pad != b:
            xb = jnp.pad(xb, ((0, b_pad - b), (0, 0)))

        cost = pl.CostEstimate(
            flops=2 * b_pad * k_in * k_out,
            transcendentals=0,
            bytes_accessed=b_pad * (k_in + k_out) * isz + k_in * k_out * 2)

        out = pl.pallas_call(
            _kron_resize_kernel,
            out_shape=jax.ShapeDtypeStruct((b_pad, k_out), x.dtype),
            grid_spec=pltpu.PrefetchScalarGridSpec(
                num_scalar_prefetch=0,
                grid=(b_pad // tb,),
                in_specs=[
                    pl.BlockSpec((tb, k_in), lambda i: (i, 0)),
                    # grid-invariant fused matrix
                    pl.BlockSpec((k_in, k_out), lambda i: (0, 0)),
                ],
                out_specs=pl.BlockSpec((tb, k_out), lambda i: (i, 0)),
            ),
            compiler_params=pltpu.CompilerParams(
                dimension_semantics=("parallel",),
                vmem_limit_bytes=vmem_limit,
            ),
            cost_estimate=cost,
        )(xb, kmat)
    else:
        # Separable fallback for large images (fused kron matrix would not fit).
        wwt = ww.T.astype(jnp.bfloat16)   # (W_in, W_out)
        wht = wh.T.astype(jnp.bfloat16)   # (H_in, H_out)

        per_img = (2 * _sub_pad(h_in) * _lane_pad(w_in) * isz   # input block
                   + 2 * _lane_pad(k_out) * isz                 # output block
                   + 2 * _sub_pad(h_in) * _lane_pad(w_in)       # bf16 x
                   + 6 * _sub_pad(h_in) * _lane_pad(w_out)      # f32 + bf16 W-pass result
                   + 2 * _sub_pad(w_out) * _lane_pad(h_in)      # transposed bf16 tmp
                   + 4 * _sub_pad(w_out) * _lane_pad(h_out)     # f32 H-pass result
                   + 4 * _lane_pad(k_out))                      # f32 before final store
        fixed = 2 * (_sub_pad(w_in) * _lane_pad(w_out)
                     + _sub_pad(h_in) * _lane_pad(h_out)) * 2
        tb = _choose_tile_batch(b, per_img, fixed, tile_budget)
        b_pad = _round_up(b, tb)

        xb = x.reshape(b, h_in, w_in)
        if b_pad != b:
            xb = jnp.pad(xb, ((0, b_pad - b), (0, 0), (0, 0)))

        cost = pl.CostEstimate(
            flops=2 * b_pad * (h_in * w_in * w_out + w_out * h_in * h_out),
            transcendentals=0,
            bytes_accessed=b_pad * (h_in * w_in + k_out) * isz
            + (w_in * w_out + h_in * h_out) * 2)

        # TODO(synk): for peak fallback perf, pre-flatten the input to (B*H_in, W_in)
        # in the wrapper (padding H_in to a multiple of 8) so the in-kernel reshapes
        # never cross (8,128) tile boundaries.
        out = pl.pallas_call(
            _two_pass_resize_kernel,
            out_shape=jax.ShapeDtypeStruct((b_pad, k_out), x.dtype),
            grid_spec=pltpu.PrefetchScalarGridSpec(
                num_scalar_prefetch=0,
                grid=(b_pad // tb,),
                in_specs=[
                    pl.BlockSpec((tb, h_in, w_in), lambda i: (i, 0, 0)),
                    pl.BlockSpec((w_in, w_out), lambda i: (0, 0)),
                    pl.BlockSpec((h_in, h_out), lambda i: (0, 0)),
                ],
                out_specs=pl.BlockSpec((tb, k_out), lambda i: (i, 0)),
            ),
            compiler_params=pltpu.CompilerParams(
                dimension_semantics=("parallel",),
                vmem_limit_bytes=vmem_limit,
            ),
            cost_estimate=cost,
        )(xb, wwt, wht)

    return out[:b].reshape(n, c, h_out, w_out)


if __name__ == "__main__":
    key = jax.random.PRNGKey(0)
    x = jax.random.normal(key, (2, 4, 16, 16), dtype=jnp.float32)
    target_size = (32, 32)

    y = jax.block_until_ready(size_adjust(x, target_size))
    assert y.shape == (2, 4, 32, 32), y.shape

    # Upsampling-only sanity check: jax.image.resize bilinear matches
    # F.interpolate(mode='bilinear', align_corners=False, antialias=False) when
    # upscaling (jax.image.resize adds antialiasing only when downscaling).
    # Tolerance accounts for bf16 MXU inputs with f32 accumulation.
    ref = jax.image.resize(x, (2, 4, 32, 32), method="bilinear")
    err = float(jnp.max(jnp.abs(y - ref)))
    assert jnp.allclose(y, ref, atol=5e-2, rtol=5e-2), err

    print("KERNEL_OK")
</pallas_src>

<mosaic_0001>
module attributes {stable_mosaic.version = 11 : i64} {
  func.func @_kron_resize_kernel(%arg0: i32, %arg1: memref<8x256xf32, #tpu.memory_space<vmem>>, %arg2: memref<256x1024xbf16, #tpu.memory_space<vmem>>, %arg3: memref<8x1024xf32, #tpu.memory_space<vmem>>) attributes {dimension_semantics = [#tpu.dimension_semantics<parallel>], iteration_bounds = array<i64: 1>, scalar_prefetch = 0 : i64, scratch_operands = 0 : i64, tpu.core_type = #tpu.core_type<tc>, window_params = [{transform_indices = @transform_0, window_bounds = array<i64: 8, 256>}, {pipeline_mode = #tpu.pipeline_mode<synchronous>, transform_indices = @transform_1, window_bounds = array<i64: 256, 1024>}, {transform_indices = @transform_2, window_bounds = array<i64: 8, 1024>}]} {
    %c0 = arith.constant 0 : index
    %c0_0 = arith.constant 0 : index
    %0 = vector.load %arg1[%c0, %c0_0] : memref<8x256xf32, #tpu.memory_space<vmem>>, vector<8x256xf32>
    %1 = arith.truncf %0 : vector<8x256xf32> to vector<8x256xbf16>
    %c0_1 = arith.constant 0 : index
    %c0_2 = arith.constant 0 : index
    %2 = vector.load %arg2[%c0_1, %c0_2] : memref<256x1024xbf16, #tpu.memory_space<vmem>>, vector<256x1024xbf16>
    %cst = arith.constant dense<0.000000e+00> : vector<8x1024xf32>
    %3 = tpu.matmul %1, %2, %cst {dimension_numbers = #tpu.dot_dimension_numbers<[1], [0], [0], [1], [0, 0, 1, 1], [], []>} : vector<8x256xbf16>, vector<256x1024xbf16>, vector<8x1024xf32> -> vector<8x1024xf32>
    %c0_3 = arith.constant 0 : index
    %c0_4 = arith.constant 0 : index
    %4 = vector.load %arg3[%c0_3, %c0_4] : memref<8x1024xf32, #tpu.memory_space<vmem>>, vector<8x1024xf32>
    tpu.vector_store %arg3[%c0_3, %c0_4], %3 {strides = array<i32>} : memref<8x1024xf32, #tpu.memory_space<vmem>>, vector<8x1024xf32>,
    return
  }
  func.func @transform_0(%arg0: i32) -> (i32, i32) {
    %c0_i32 = arith.constant 0 : i32
    %c0_i32_0 = arith.constant 0 : i32
    return %arg0, %c0_i32 : i32, i32
  }
  func.func @transform_1(%arg0: i32) -> (i32, i32) {
    %c0_i32 = arith.constant 0 : i32
    %c0_i32_0 = arith.constant 0 : i32
    %c0_i32_1 = arith.constant 0 : i32
    return %c0_i32, %c0_i32_0 : i32, i32
  }
  func.func @transform_2(%arg0: i32) -> (i32, i32) {
    %c0_i32 = arith.constant 0 : i32
    %c0_i32_0 = arith.constant 0 : i32
    return %arg0, %c0_i32 : i32, i32
  }
}

</mosaic_0001>

<bundles_post_ra>
// kernel: tpu_custom_call.1
= control target key start
LH: loop header
LB: loop body
LE: loop exit
PB: predicated region body
PF: predicated region fallthrough
CT: control target
= control target key end

     0   :  { %7 = vsyncpa [#allocation3], 0  ;;  %s1820_s0 = inlined_call_operand.hbm [shape: f32[8,256], index: 0, kind: input, shape index: {}]   ;;  %s1821_s1 = inlined_call_operand.hbm [shape: bf16[256,1024], index: 1, kind: input, shape index: {}]   ;;  %s1822_s2 = inlined_call_operand.hbm [shape: f32[8,1024], index: 2, kind: output, shape index: {}]  }
   0x1   :  { %8 = vsyncpa [#allocation6], 0 }
   0x2   :  { %9 = vsyncpa [#allocation4], 0  ;;  %s15_s11 = sshll.u32 %s1820_s0, 4  ;;  %s1771_s12 = smov [#allocation2]   ;;  %s16_s11 = int_to_ptr.hbm [resolvable:$true] %s15_s11 }
   0x3   :  { %s17_s13 = sshll.u32 %s1771_s12, 4  ;;  %s25_s16 = sshll.u32 %s1821_s1, 4  ;;  %s18_s13 = int_to_ptr.vmem [resolvable:$true] %s17_s13  ;;  %s26_s16 = int_to_ptr.hbm [resolvable:$true] %s25_s16 }
   0x4   :  { %20 = dma.hbm_to_vmem [thread:$0]  %s16_s11, 256, %s18_s13, [#allocation3]  }
   0x5   :  { %s1772_s17 = smov [#allocation5]   ;;  %s1773_s19 = smov 512  }
   0x6   :  { %s27_s18 = sshll.u32 %s1772_s17, 4  ;;  %s1774_s20 = smov 32   ;;  %s28_s18 = int_to_ptr.vmem [resolvable:$true] %s27_s18 }
   0x7   :  { %33 = dma.hbm_to_vmem [thread:$0]  %s26_s16, 16384, %s28_s18, [#allocation6], %s1773_s19, %s1773_s19, %s1774_s20  }
   0x8   :  { %1765 = dma.done.wait [#allocation3], 256  }
   0x9   :  { %1766 = vsyncadd [#allocation3], 4294967040 }
   0xa   :  { %1767 = dma.done.wait [#allocation6], 16384  }
   0xb   :  { %1768 = vsyncadd [#allocation6], 4294950912  ;;  %v1274_v0 = vld [vmem:[#allocation5 + $0x1c0] sm:$0xf]  ;;  %v1616_v5 = vld [vmem:[#allocation5 + $0x1c4] sm:$0xf] }
   0xc   :  { %v1620_v1 = vld [vmem:[#allocation5 + $0x1dc] sm:$0xf0]  ;;  %v1276_v6 = vld [vmem:[#allocation5 + $0x1e0] sm:$0xf0]  ;;  %s1775_s0 = smov [#allocation7]   ;;  %s1037_s23 = sshll.u32 %s1822_s2, 4  ;;  %s1038_s23 = int_to_ptr.hbm [resolvable:$true] %s1037_s23 }
   0xd   :  { %v1530_v2 = vld [vmem:[#allocation5 + $0x3c0] sm:$0xf]  ;;  %v1275_v3 = vor.u32 %v1620_v1, %v1274_v0  ;;  %v1279_v8 = vor.u32 %v1616_v5, %v1276_v6  ;;  %v1680_v9 = vld [vmem:[#allocation5 + $0x3c4] sm:$0xf]  ;;  %s1035_s1 = sshll.u32 %s1775_s0, 4  ;;  %s1036_s1 = int_to_ptr.vmem [resolvable:$true] %s1035_s1 }
   0xe   :  { %v1684_v4 = vld [vmem:[#allocation5 + $0x3dc] sm:$0xf0]  ;;  %v1532_v10 = vld [vmem:[#allocation5 + $0x3e0] sm:$0xf0] }
   0xf   :  { %v1531_v7 = vor.u32 %v1684_v4, %v1530_v2  ;;  %v1242_v11 = vld [vmem:[#allocation5 + $0x180] sm:$0xf]  ;;  %814 = vmatpush.bf16.msra.mxu0 %v1275_v3  ;;  %v1535_v12 = vor.u32 %v1680_v9, %v1532_v10  ;;  %840 = vmatpush.bf16.msra.mxu2 %v1279_v8  ;;  %v1608_v18 = vld [vmem:[#allocation5 + $0x184] sm:$0xf] }
  0x10   :  { %v1612_v13 = vld [vmem:[#allocation5 + $0x19c] sm:$0xf0]  ;;  %v1244_v19 = vld [vmem:[#allocation5 + $0x1a0] sm:$0xf0] }
  0x11   :  { %v1498_v14 = vld [vmem:[#allocation5 + $0x380] sm:$0xf]  ;;  %827 = vmatpush.bf16.msra.mxu1 %v1531_v7  ;;  %v1243_v16 = vor.u32 %v1612_v13, %v1242_v11  ;;  %v1672_v20 = vld [vmem:[#allocation5 + $0x384] sm:$0xf]  ;;  %853 = vmatpush.bf16.msra.mxu3 %v1535_v12  ;;  %v1247_v21 = vor.u32 %v1608_v18, %v1244_v19 }
  0x12   :  { %v1676_v15 = vld [vmem:[#allocation5 + $0x39c] sm:$0xf0]  ;;  %v1500_v22 = vld [vmem:[#allocation5 + $0x3a0] sm:$0xf0] }
  0x13   :  { %v1499_v17 = vor.u32 %v1676_v15, %v1498_v14  ;;  %v1210_v23 = vld [vmem:[#allocation5 + $0x140] sm:$0xf]  ;;  %v1503_v25 = vor.u32 %v1672_v20, %v1500_v22  ;;  %v1600_v28 = vld [vmem:[#allocation5 + $0x144] sm:$0xf]  ;;  %815 = vmatpush.bf16.msra.mxu0 %v1243_v16  ;;  %841 = vmatpush.bf16.msra.mxu2 %v1247_v21 }
  0x14   :  { %v1604_v24 = vld [vmem:[#allocation5 + $0x15c] sm:$0xf0]  ;;  %v1212_v30 = vld [vmem:[#allocation5 + $0x160] sm:$0xf0] }
  0x15   :  { %v1466_v26 = vld [vmem:[#allocation5 + $0x340] sm:$0xf]  ;;  %v1211_v29 = vor.u32 %v1604_v24, %v1210_v23  ;;  %v1664_v31 = vld [vmem:[#allocation5 + $0x344] sm:$0xf]  ;;  %828 = vmatpush.bf16.msra.mxu1 %v1499_v17  ;;  %v1215_v34 = vor.u32 %v1600_v28, %v1212_v30  ;;  %854 = vmatpush.bf16.msra.mxu3 %v1503_v25  ;;  %v1282_v28 = vld [vmem:[#allocation5 + $0x1c8] sm:$0xf] }
  0x16   :  { %v1668_v27 = vld [vmem:[#allocation5 + $0x35c] sm:$0xf0]  ;;  %v1468_v32 = vld [vmem:[#allocation5 + $0x360] sm:$0xf0]  ;;  %v1538_v30 = vld [vmem:[#allocation5 + $0x3c8] sm:$0xf] }
  0x17   :  { %v1467_v33 = vor.u32 %v1668_v27, %v1466_v26  ;;  %v1178_v35 = vld [vmem:[#allocation5 + $0x100] sm:$0xf]  ;;  %v1471_v38 = vor.u32 %v1664_v31, %v1468_v32  ;;  %v1592_v40 = vld [vmem:[#allocation5 + $0x104] sm:$0xf]  ;;  %816 = vmatpush.bf16.msra.mxu0 %v1211_v29  ;;  %842 = vmatpush.bf16.msra.mxu2 %v1215_v34  ;;  %v1621_v29 = vld [vmem:[#allocation5 + $0x1e4] sm:$0xf0] }
  0x18   :  { %v1596_v36 = vld [vmem:[#allocation5 + $0x11c] sm:$0xf0]  ;;  %v1180_v41 = vld [vmem:[#allocation5 + $0x120] sm:$0xf0]  ;;  %v1685_v32 = vld [vmem:[#allocation5 + $0x3e4] sm:$0xf0] }
  0x19   :  { %v1434_v37 = vld [vmem:[#allocation5 + $0x300] sm:$0xf]  ;;  %v1656_v42 = vld [vmem:[#allocation5 + $0x304] sm:$0xf]  ;;  %v1179_v44 = vor.u32 %v1596_v36, %v1178_v35  ;;  %829 = vmatpush.bf16.msra.mxu1 %v1467_v33  ;;  %v1183_v46 = vor.u32 %v1592_v40, %v1180_v41  ;;  %855 = vmatpush.bf16.msra.mxu3 %v1471_v38  ;;  %v1617_v33 = vld [vmem:[#allocation5 + $0x1cc] sm:$0xf]  ;;  %v1283_v40 = vor.u32 %v1621_v29, %v1282_v28 }
  0x1a   :  { %v1660_v39 = vld [vmem:[#allocation5 + $0x31c] sm:$0xf0]  ;;  %v1436_v43 = vld [vmem:[#allocation5 + $0x320] sm:$0xf0]  ;;  %v1284_v34 = vld [vmem:[#allocation5 + $0x1e8] sm:$0xf0]  ;;  %v1539_v41 = vor.u32 %v1685_v32, %v1538_v30 }
  0x1b   :  { %v1435_v45 = vor.u32 %v1660_v39, %v1434_v37  ;;  %v1146_v47 = vld [vmem:[#allocation5 + $0xc0] sm:$0xf]  ;;  %v1439_v50 = vor.u32 %v1656_v42, %v1436_v43  ;;  %v1584_v52 = vld [vmem:[#allocation5 + $0xc4] sm:$0xf]  ;;  %817 = vmatpush.bf16.msra.mxu0 %v1179_v44  ;;  %843 = vmatpush.bf16.msra.mxu2 %v1183_v46  ;;  %v1681_v37 = vld [vmem:[#allocation5 + $0x3cc] sm:$0xf]  ;;  %v1287_v42 = vor.u32 %v1617_v33, %v1284_v34 }
  0x1c   :  { %v1588_v48 = vld [vmem:[#allocation5 + $0xdc] sm:$0xf0]  ;;  %v1148_v53 = vld [vmem:[#allocation5 + $0xe0] sm:$0xf0]  ;;  %v1540_v38 = vld [vmem:[#allocation5 + $0x3e8] sm:$0xf0] }
  0x1d   :  { %v1402_v49 = vld [vmem:[#allocation5 + $0x2c0] sm:$0xf]  ;;  %v1648_v54 = vld [vmem:[#allocation5 + $0x2c4] sm:$0xf]  ;;  %v1147_v56 = vor.u32 %v1588_v48, %v1146_v47  ;;  %830 = vmatpush.bf16.msra.mxu1 %v1435_v45  ;;  %v1151_v58 = vor.u32 %v1584_v52, %v1148_v53  ;;  %856 = vmatpush.bf16.msra.mxu3 %v1439_v50  ;;  %v1250_v43 = vld [vmem:[#allocation5 + $0x188] sm:$0xf]  ;;  %v1543_v46 = vor.u32 %v1681_v37, %v1540_v38 }
  0x1e   :  { %v1652_v51 = vld [vmem:[#allocation5 + $0x2dc] sm:$0xf0]  ;;  %v1404_v55 = vld [vmem:[#allocation5 + $0x2e0] sm:$0xf0]  ;;  %v1613_v44 = vld [vmem:[#allocation5 + $0x1a4] sm:$0xf0] }
  0x1f   :  { %v1403_v57 = vor.u32 %v1652_v51, %v1402_v49  ;;  %v1114_v59 = vld [vmem:[#allocation5 + $0x80] sm:$0xf]  ;;  %v1407_v62 = vor.u32 %v1648_v54, %v1404_v55  ;;  %v1576_v0 = vld [vmem:[#allocation5 + $0x84] sm:$0xf]  ;;  %818 = vmatpush.bf16.msra.mxu0 %v1147_v56  ;;  %844 = vmatpush.bf16.msra.mxu2 %v1151_v58  ;;  %v1506_v45 = vld [vmem:[#allocation5 + $0x388] sm:$0xf]  ;;  %v1251_v52 = vor.u32 %v1613_v44, %v1250_v43 }
  0x20   :  { %v1580_v60 = vld [vmem:[#allocation5 + $0x9c] sm:$0xf0]  ;;  %v1116_v1 = vld [vmem:[#allocation5 + $0xa0] sm:$0xf0]  ;;  %v1677_v47 = vld [vmem:[#allocation5 + $0x3a4] sm:$0xf0] }
  0x21   :  { %v1370_v61 = vld [vmem:[#allocation5 + $0x280] sm:$0xf]  ;;  %v1640_v2 = vld [vmem:[#allocation5 + $0x284] sm:$0xf]  ;;  %v1115_v4 = vor.u32 %v1580_v60, %v1114_v59  ;;  %831 = vmatpush.bf16.msra.mxu1 %v1403_v57  ;;  %v1119_v6 = vor.u32 %v1576_v0, %v1116_v1  ;;  %857 = vmatpush.bf16.msra.mxu3 %v1407_v62  ;;  %v1609_v48 = vld [vmem:[#allocation5 + $0x18c] sm:$0xf]  ;;  %v1507_v54 = vor.u32 %v1677_v47, %v1506_v45 }
  0x22   :  { %v1644_v63 = vld [vmem:[#allocation5 + $0x29c] sm:$0xf0]  ;;  %v1372_v3 = vld [vmem:[#allocation5 + $0x2a0] sm:$0xf0]  ;;  %v1252_v49 = vld [vmem:[#allocation5 + $0x1a8] sm:$0xf0] }
  0x23   :  { %v1371_v5 = vor.u32 %v1644_v63, %v1370_v61  ;;  %v1082_v7 = vld [vmem:[#allocation5 + $0x40] sm:$0xf]  ;;  %v1375_v10 = vor.u32 %v1640_v2, %v1372_v3  ;;  %v1568_v12 = vld [vmem:[#allocation5 + $0x44] sm:$0xf]  ;;  %819 = vmatpush.bf16.msra.mxu0 %v1115_v4  ;;  %845 = vmatpush.bf16.msra.mxu2 %v1119_v6  ;;  %v1673_v50 = vld [vmem:[#allocation5 + $0x38c] sm:$0xf]  ;;  %v1255_v55 = vor.u32 %v1609_v48, %v1252_v49 }
  0x24   :  { %v1572_v8 = vld [vmem:[#allocation5 + $0x5c] sm:$0xf0]  ;;  %v1084_v13 = vld [vmem:[#allocation5 + $0x60] sm:$0xf0]  ;;  %v1508_v51 = vld [vmem:[#allocation5 + $0x3a8] sm:$0xf0] }
  0x25   :  { %v1338_v9 = vld [vmem:[#allocation5 + $0x240] sm:$0xf]  ;;  %v1632_v14 = vld [vmem:[#allocation5 + $0x244] sm:$0xf]  ;;  %v1083_v16 = vor.u32 %v1572_v8, %v1082_v7  ;;  %832 = vmatpush.bf16.msra.mxu1 %v1371_v5  ;;  %v1087_v20 = vor.u32 %v1568_v12, %v1084_v13  ;;  %858 = vmatpush.bf16.msra.mxu3 %v1375_v10  ;;  %v1218_v53 = vld [vmem:[#allocation5 + $0x148] sm:$0xf]  ;;  %v1511_v59 = vor.u32 %v1673_v50, %v1508_v51 }
  0x26   :  { %v1636_v11 = vld [vmem:[#allocation5 + $0x25c] sm:$0xf0]  ;;  %v1340_v15 = vld [vmem:[#allocation5 + $0x260] sm:$0xf0]  ;;  %v1605_v56 = vld [vmem:[#allocation5 + $0x164] sm:$0xf0] }
  0x27   :  { %v1050_v17 = vld [vmem:[#allocation5] sm:$0xf]  ;;  %v1339_v19 = vor.u32 %v1636_v11, %v1338_v9  ;;  %v1560_v23 = vld [vmem:[#allocation5 + $0x4] sm:$0xf]  ;;  %v1343_v24 = vor.u32 %v1632_v14, %v1340_v15  ;;  %820 = vmatpush.bf16.msra.mxu0 %v1083_v16  ;;  %846 = vmatpush.bf16.msra.mxu2 %v1087_v20  ;;  %v1474_v57 = vld [vmem:[#allocation5 + $0x348] sm:$0xf]  ;;  %v1219_v0 = vor.u32 %v1605_v56, %v1218_v53 }
  0x28   :  { %v1564_v18 = vld [vmem:[#allocation5 + $0x1c] sm:$0xf0]  ;;  %v1052_v25 = vld [vmem:[#allocation5 + $0x20] sm:$0xf0]  ;;  %v1669_v58 = vld [vmem:[#allocation5 + $0x364] sm:$0xf0] }
  0x29   :  { %v1306_v21 = vld [vmem:[#allocation5 + $0x200] sm:$0xf]  ;;  %v1624_v26 = vld [vmem:[#allocation5 + $0x204] sm:$0xf]  ;;  %v1051_v31 = vor.u32 %v1564_v18, %v1050_v17  ;;  %833 = vmatpush.bf16.msra.mxu1 %v1339_v19  ;;  %v1055_v36 = vor.u32 %v1560_v23, %v1052_v25  ;;  %859 = vmatpush.bf16.msra.mxu3 %v1343_v24  ;;  %v1601_v60 = vld [vmem:[#allocation5 + $0x14c] sm:$0xf]  ;;  %v1475_v1 = vor.u32 %v1669_v58, %v1474_v57 }
  0x2a   :  { %v1628_v22 = vld [vmem:[#allocation5 + $0x21c] sm:$0xf0]  ;;  %v1308_v27 = vld [vmem:[#allocation5 + $0x220] sm:$0xf0]  ;;  %v1220_v61 = vld [vmem:[#allocation5 + $0x168] sm:$0xf0] }
  0x2b   :  { %v1307_v35 = vor.u32 %v1628_v22, %v1306_v21  ;;  %v1311_v39 = vor.u32 %v1624_v26, %v1308_v27  ;;  %821 = vmatpush.bf16.msra.mxu0 %v1051_v31  ;;  %847 = vmatpush.bf16.msra.mxu2 %v1055_v36  ;;  %v1665_v62 = vld [vmem:[#allocation5 + $0x34c] sm:$0xf]  ;;  %v42_v2 = vld [vmem:[#allocation2] sm:$0xff]  ;;  %v43_v3 = vld [vmem:[#allocation2 + $0x8] sm:$0xff]  ;;  %v1223_v4 = vor.u32 %v1601_v60, %v1220_v61 }
  0x2c   :  { %v1476_v63 = vld [vmem:[#allocation5 + $0x368] sm:$0xf0]  ;;  %v1186_v5 = vld [vmem:[#allocation5 + $0x108] sm:$0xf]  ;;  %v1797_v8 = vpack.c.bf16 %v42_v2, %v42_v2  ;;  %v1799_v9 = vpack.c.bf16 %v43_v3, %v43_v3  ;;  %v1546_v2 = vld [vmem:[#allocation5 + $0x3d0] sm:$0xf] }
  0x2d   :  { %834 = vmatpush.bf16.msra.mxu1 %v1307_v35  ;;  %860 = vmatpush.bf16.msra.mxu3 %v1311_v39  ;;  %v1597_v6 = vld [vmem:[#allocation5 + $0x124] sm:$0xf0]  ;;  %v1479_v10 = vor.u32 %v1665_v62, %v1476_v63  ;;  %v1593_v12 = vld [vmem:[#allocation5 + $0x10c] sm:$0xf] }
  0x2e   :  { %v1442_v7 = vld [vmem:[#allocation5 + $0x308] sm:$0xf]  ;;  %v1188_v13 = vld [vmem:[#allocation5 + $0x128] sm:$0xf0]  ;;  %848 = vmatmul.bf16.vlgmr.msra.gmra.mxu2 %v1797_v8  ;;  %v1187_v16 = vor.u32 %v1597_v6, %v1186_v5  ;;  %822 = vmatmul.bf16.vlgmr.msra.gmra.mxu0 %v1797_v8  ;;  %v1618_v5 = vld [vmem:[#allocation5 + $0x1d4] sm:$0xf] }
  0x2f   :  { %866 = vmatpush.bf16.msrb.mxu0 %v1283_v40  ;;  %892 = vmatpush.bf16.msrb.mxu2 %v1287_v42  ;;  %v1661_v11 = vld [vmem:[#allocation5 + $0x324] sm:$0xf0]  ;;  %v1657_v14 = vld [vmem:[#allocation5 + $0x30c] sm:$0xf]  ;;  %v1191_v18 = vor.u32 %v1593_v12, %v1188_v13  ;;  %v1292_v6 = vld [vmem:[#allocation5 + $0x1f0] sm:$0xf0] }
  0x30   :  { %v1444_v15 = vld [vmem:[#allocation5 + $0x328] sm:$0xf0]  ;;  %861 = vmatmul.bf16.vlgmr.msra.gmra.mxu3 %v1799_v9  ;;  %835 = vmatmul.bf16.vlgmr.msra.gmra.mxu1 %v1799_v9  ;;  %v1443_v17 = vor.u32 %v1661_v11, %v1442_v7  ;;  %v1154_v19 = vld [vmem:[#allocation5 + $0xc8] sm:$0xf]  ;;  %v1682_v11 = vld [vmem:[#allocation5 + $0x3d4] sm:$0xf] }
  0x31   :  { %879 = vmatpush.bf16.msrb.mxu1 %v1539_v41  ;;  %905 = vmatpush.bf16.msrb.mxu3 %v1543_v46  ;;  %v1589_v20 = vld [vmem:[#allocation5 + $0xe4] sm:$0xf0]  ;;  %v1447_v22 = vor.u32 %v1657_v14, %v1444_v15  ;;  %v1585_v24 = vld [vmem:[#allocation5 + $0xcc] sm:$0xf]  ;;  %v1548_v12 = vld [vmem:[#allocation5 + $0x3f0] sm:$0xf0] }
  0x32   :  { %v1410_v21 = vld [vmem:[#allocation5 + $0x2c8] sm:$0xf]  ;;  %v1156_v25 = vld [vmem:[#allocation5 + $0xe8] sm:$0xf0]  ;;  %v1155_v28 = vor.u32 %v1589_v20, %v1154_v19  ;;  %v1514_v19 = vld [vmem:[#allocation5 + $0x390] sm:$0xf]  ;;  %v1551_v20 = vor.u32 %v1682_v11, %v1548_v12 }
  0x33   :  { %867 = vmatpush.bf16.msrb.mxu0 %v1251_v52  ;;  %893 = vmatpush.bf16.msrb.mxu2 %v1255_v55  ;;  %v1653_v23 = vld [vmem:[#allocation5 + $0x2e4] sm:$0xf0]  ;;  %v1649_v26 = vld [vmem:[#allocation5 + $0x2cc] sm:$0xf]  ;;  %v1159_v30 = vor.u32 %v1585_v24, %v1156_v25  ;;  %v1674_v24 = vld [vmem:[#allocation5 + $0x394] sm:$0xf] }
  0x34   :  { %v1412_v27 = vld [vmem:[#allocation5 + $0x2e8] sm:$0xf0]  ;;  %v1411_v29 = vor.u32 %v1653_v23, %v1410_v21  ;;  %v1122_v31 = vld [vmem:[#allocation5 + $0x88] sm:$0xf]  ;;  %v1678_v21 = vld [vmem:[#allocation5 + $0x3ac] sm:$0xf0] }
  0x35   :  { %880 = vmatpush.bf16.msrb.mxu1 %v1507_v54  ;;  %906 = vmatpush.bf16.msrb.mxu3 %v1511_v59  ;;  %v1581_v32 = vld [vmem:[#allocation5 + $0xa4] sm:$0xf0]  ;;  %v1415_v34 = vor.u32 %v1649_v26, %v1412_v27  ;;  %v1577_v36 = vld [vmem:[#allocation5 + $0x8c] sm:$0xf]  ;;  %v1260_v23 = vld [vmem:[#allocation5 + $0x1b0] sm:$0xf0]  ;;  %v1515_v27 = vor.u32 %v1678_v21, %v1514_v19 }
  0x36   :  { %v1378_v33 = vld [vmem:[#allocation5 + $0x288] sm:$0xf]  ;;  %v1124_v37 = vld [vmem:[#allocation5 + $0xa8] sm:$0xf0]  ;;  %v1123_v40 = vor.u32 %v1581_v32, %v1122_v31  ;;  %v1516_v25 = vld [vmem:[#allocation5 + $0x3b0] sm:$0xf0] }
  0x37   :  { %868 = vmatpush.bf16.msrb.mxu0 %v1219_v0  ;;  %894 = vmatpush.bf16.msrb.mxu2 %v1223_v4  ;;  %v1645_v35 = vld [vmem:[#allocation5 + $0x2a4] sm:$0xf0]  ;;  %v1641_v38 = vld [vmem:[#allocation5 + $0x28c] sm:$0xf]  ;;  %v1127_v42 = vor.u32 %v1577_v36, %v1124_v37  ;;  %v1290_v0 = vld [vmem:[#allocation5 + $0x1d0] sm:$0xf]  ;;  %v1519_v32 = vor.u32 %v1674_v24, %v1516_v25 }
  0x38   :  { %v1380_v39 = vld [vmem:[#allocation5 + $0x2a8] sm:$0xf0]  ;;  %v1379_v41 = vor.u32 %v1645_v35, %v1378_v33  ;;  %v1090_v43 = vld [vmem:[#allocation5 + $0x48] sm:$0xf]  ;;  %v1686_v4 = vld [vmem:[#allocation5 + $0x3ec] sm:$0xf0] }
  0x39   :  { %881 = vmatpush.bf16.msrb.mxu1 %v1475_v1  ;;  %907 = vmatpush.bf16.msrb.mxu3 %v1479_v10  ;;  %v1573_v44 = vld [vmem:[#allocation5 + $0x64] sm:$0xf0]  ;;  %v1383_v46 = vor.u32 %v1641_v38, %v1380_v39  ;;  %v1569_v48 = vld [vmem:[#allocation5 + $0x4c] sm:$0xf]  ;;  %v1622_v1 = vld [vmem:[#allocation5 + $0x1ec] sm:$0xf0]  ;;  %v1547_v15 = vor.u32 %v1686_v4, %v1546_v2 }
  0x3a   :  { %v1346_v45 = vld [vmem:[#allocation5 + $0x248] sm:$0xf]  ;;  %v1092_v49 = vld [vmem:[#allocation5 + $0x68] sm:$0xf0]  ;;  %v1091_v52 = vor.u32 %v1573_v44, %v1090_v43  ;;  %v1291_v14 = vor.u32 %v1622_v1, %v1290_v0  ;;  %v1482_v31 = vld [vmem:[#allocation5 + $0x350] sm:$0xf] }
  0x3b   :  { %869 = vmatpush.bf16.msrb.mxu0 %v1187_v16  ;;  %895 = vmatpush.bf16.msrb.mxu2 %v1191_v18  ;;  %v1637_v47 = vld [vmem:[#allocation5 + $0x264] sm:$0xf0]  ;;  %v1633_v50 = vld [vmem:[#allocation5 + $0x24c] sm:$0xf]  ;;  %v1095_v56 = vor.u32 %v1569_v48, %v1092_v49  ;;  %v1295_v16 = vor.u32 %v1618_v5, %v1292_v6  ;;  %v1614_v18 = vld [vmem:[#allocation5 + $0x1ac] sm:$0xf0] }
  0x3c   :  { %v1348_v51 = vld [vmem:[#allocation5 + $0x268] sm:$0xf0]  ;;  %v1058_v53 = vld [vmem:[#allocation5 + $0x8] sm:$0xf]  ;;  %v1347_v55 = vor.u32 %v1637_v47, %v1346_v45  ;;  %v1670_v33 = vld [vmem:[#allocation5 + $0x36c] sm:$0xf0] }
  0x3d   :  { %882 = vmatpush.bf16.msrb.mxu1 %v1443_v17  ;;  %908 = vmatpush.bf16.msrb.mxu3 %v1447_v22  ;;  %v1565_v54 = vld [vmem:[#allocation5 + $0x24] sm:$0xf0]  ;;  %v1561_v59 = vld [vmem:[#allocation5 + $0xc] sm:$0xf]  ;;  %v1351_v60 = vor.u32 %v1633_v50, %v1348_v51  ;;  %v1258_v17 = vld [vmem:[#allocation5 + $0x190] sm:$0xf]  ;;  %v1483_v39 = vor.u32 %v1670_v33, %v1482_v31 }
  0x3e   :  { %v1314_v57 = vld [vmem:[#allocation5 + $0x208] sm:$0xf]  ;;  %v1060_v61 = vld [vmem:[#allocation5 + $0x28] sm:$0xf0]  ;;  %v1059_v3 = vor.u32 %v1565_v54, %v1058_v53  ;;  %v1610_v22 = vld [vmem:[#allocation5 + $0x194] sm:$0xf]  ;;  %v1259_v26 = vor.u32 %v1614_v18, %v1258_v17 }
  0x3f   :  { %870 = vmatpush.bf16.msrb.mxu0 %v1155_v28  ;;  %896 = vmatpush.bf16.msrb.mxu2 %v1159_v30  ;;  %v1629_v58 = vld [vmem:[#allocation5 + $0x224] sm:$0xf0]  ;;  %v1625_v62 = vld [vmem:[#allocation5 + $0x20c] sm:$0xf]  ;;  %v1063_v10 = vor.u32 %v1561_v59, %v1060_v61  ;;  %v1263_v28 = vor.u32 %v1610_v22, %v1260_v23  ;;  %v1606_v30 = vld [vmem:[#allocation5 + $0x16c] sm:$0xf0] }
  0x40   :  { %v1316_v63 = vld [vmem:[#allocation5 + $0x228] sm:$0xf0]  ;;  %v1315_v7 = vor.u32 %v1629_v58, %v1314_v57  ;;  %v1228_v35 = vld [vmem:[#allocation5 + $0x170] sm:$0xf0]  ;;  %v1450_v43 = vld [vmem:[#allocation5 + $0x310] sm:$0xf] }
  0x41   :  { %883 = vmatpush.bf16.msrb.mxu1 %v1411_v29  ;;  %909 = vmatpush.bf16.msrb.mxu3 %v1415_v34  ;;  %v1319_v13 = vor.u32 %v1625_v62, %v1316_v63  ;;  %v1226_v29 = vld [vmem:[#allocation5 + $0x150] sm:$0xf]  ;;  %v1602_v34 = vld [vmem:[#allocation5 + $0x154] sm:$0xf] }
  0x42   :  { %v1666_v36 = vld [vmem:[#allocation5 + $0x354] sm:$0xf]  ;;  %v1227_v38 = vor.u32 %v1606_v30, %v1226_v29  ;;  %v1662_v45 = vld [vmem:[#allocation5 + $0x32c] sm:$0xf0] }
  0x43   :  { %871 = vmatpush.bf16.msrb.mxu0 %v1123_v40  ;;  %897 = vmatpush.bf16.msrb.mxu2 %v1127_v42  ;;  %v1484_v37 = vld [vmem:[#allocation5 + $0x370] sm:$0xf0]  ;;  %v1231_v40 = vor.u32 %v1602_v34, %v1228_v35  ;;  %v1598_v42 = vld [vmem:[#allocation5 + $0x12c] sm:$0xf0]  ;;  %v1451_v51 = vor.u32 %v1662_v45, %v1450_v43  ;;  %v1683_v45 = vld [vmem:[#allocation5 + $0x3dc] sm:$0xf] }
  0x44   :  { %v1487_v44 = vor.u32 %v1666_v36, %v1484_v37  ;;  %v1196_v47 = vld [vmem:[#allocation5 + $0x130] sm:$0xf0]  ;;  %v1162_v53 = vld [vmem:[#allocation5 + $0xd0] sm:$0xf]  ;;  %v1298_v36 = vld [vmem:[#allocation5 + $0x1d8] sm:$0xf] }
  0x45   :  { %884 = vmatpush.bf16.msrb.mxu1 %v1379_v41  ;;  %910 = vmatpush.bf16.msrb.mxu3 %v1383_v46  ;;  %v1194_v41 = vld [vmem:[#allocation5 + $0x110] sm:$0xf]  ;;  %v1594_v46 = vld [vmem:[#allocation5 + $0x114] sm:$0xf]  ;;  %v1623_v37 = vld [vmem:[#allocation5 + $0x1f4] sm:$0xf0] }
  0x46   :  { %v1658_v48 = vld [vmem:[#allocation5 + $0x314] sm:$0xf]  ;;  %v1195_v50 = vor.u32 %v1598_v42, %v1194_v41  ;;  %v1590_v54 = vld [vmem:[#allocation5 + $0xec] sm:$0xf0]  ;;  %v1619_v41 = vld [vmem:[#allocation5 + $0x1dc] sm:$0xf] }
  0x47   :  { %872 = vmatpush.bf16.msrb.mxu0 %v1091_v52  ;;  %898 = vmatpush.bf16.msrb.mxu2 %v1095_v56  ;;  %v1452_v49 = vld [vmem:[#allocation5 + $0x330] sm:$0xf0]  ;;  %v1199_v52 = vor.u32 %v1594_v46, %v1196_v47  ;;  %v1654_v57 = vld [vmem:[#allocation5 + $0x2ec] sm:$0xf0]  ;;  %v1163_v62 = vor.u32 %v1590_v54, %v1162_v53  ;;  %v1300_v42 = vld [vmem:[#allocation5 + $0x1f8] sm:$0xf0] }
  0x48   :  { %v1455_v56 = vor.u32 %v1658_v48, %v1452_v49  ;;  %v1586_v58 = vld [vmem:[#allocation5 + $0xd4] sm:$0xf]  ;;  %v1130_v1 = vld [vmem:[#allocation5 + $0x90] sm:$0xf]  ;;  %v1556_v46 = vld [vmem:[#allocation5 + $0x3f8] sm:$0xf0]  ;;  %v1299_v48 = vor.u32 %v1623_v37, %v1298_v36 }
  0x49   :  { %885 = vmatpush.bf16.msrb.mxu1 %v1347_v55  ;;  %911 = vmatpush.bf16.msrb.mxu3 %v1351_v60  ;;  %v1418_v55 = vld [vmem:[#allocation5 + $0x2d0] sm:$0xf]  ;;  %v1164_v59 = vld [vmem:[#allocation5 + $0xf0] sm:$0xf0]  ;;  %v1522_v53 = vld [vmem:[#allocation5 + $0x398] sm:$0xf]  ;;  %v1559_v54 = vor.u32 %v1683_v45, %v1556_v46 }
  0x4a   :  { %v1650_v60 = vld [vmem:[#allocation5 + $0x2d4] sm:$0xf]  ;;  %v1419_v63 = vor.u32 %v1654_v57, %v1418_v55  ;;  %v1167_v0 = vor.u32 %v1586_v58, %v1164_v59  ;;  %v1582_v2 = vld [vmem:[#allocation5 + $0xac] sm:$0xf0]  ;;  %v1679_v55 = vld [vmem:[#allocation5 + $0x3b4] sm:$0xf0] }
  0x4b   :  { %873 = vmatpush.bf16.msrb.mxu0 %v1059_v3  ;;  %899 = vmatpush.bf16.msrb.mxu2 %v1063_v10  ;;  %v1420_v61 = vld [vmem:[#allocation5 + $0x2f0] sm:$0xf0]  ;;  %v1386_v3 = vld [vmem:[#allocation5 + $0x290] sm:$0xf]  ;;  %v1131_v12 = vor.u32 %v1582_v2, %v1130_v1  ;;  %v1268_v57 = vld [vmem:[#allocation5 + $0x1b8] sm:$0xf0] }
  0x4c   :  { %v1423_v4 = vor.u32 %v1650_v60, %v1420_v61  ;;  %v1646_v5 = vld [vmem:[#allocation5 + $0x2ac] sm:$0xf0]  ;;  %v1578_v6 = vld [vmem:[#allocation5 + $0x94] sm:$0xf]  ;;  %v1675_v58 = vld [vmem:[#allocation5 + $0x39c] sm:$0xf]  ;;  %v1523_v61 = vor.u32 %v1679_v55, %v1522_v53 }
  0x4d   :  { %886 = vmatpush.bf16.msrb.mxu1 %v1315_v7  ;;  %912 = vmatpush.bf16.msrb.mxu3 %v1319_v13  ;;  %v1132_v7 = vld [vmem:[#allocation5 + $0xb0] sm:$0xf0]  ;;  %v1387_v13 = vor.u32 %v1646_v5, %v1386_v3  ;;  %v1354_v17 = vld [vmem:[#allocation5 + $0x250] sm:$0xf]  ;;  %v1524_v59 = vld [vmem:[#allocation5 + $0x3b8] sm:$0xf0] }
  0x4e   :  { %900 = vmatmul.bf16.vlgmr.msrb.gmra.mxu2 %v1797_v8  ;;  %874 = vmatmul.bf16.vlgmr.msrb.gmra.mxu0 %v1797_v8  ;;  %v1642_v10 = vld [vmem:[#allocation5 + $0x294] sm:$0xf]  ;;  %v1638_v19 = vld [vmem:[#allocation5 + $0x26c] sm:$0xf0]  ;;  %v1490_v1 = vld [vmem:[#allocation5 + $0x358] sm:$0xf]  ;;  %v1527_v2 = vor.u32 %v1675_v58, %v1524_v59 }
  0x4f   :  { %918 = vmatpush.bf16.msra.mxu0 %v1291_v14  ;;  %944 = vmatpush.bf16.msra.mxu2 %v1295_v16  ;;  %v1388_v11 = vld [vmem:[#allocation5 + $0x2b0] sm:$0xf0]  ;;  %v1135_v14 = vor.u32 %v1578_v6, %v1132_v7  ;;  %v1574_v16 = vld [vmem:[#allocation5 + $0x6c] sm:$0xf0]  ;;  %v1671_v3 = vld [vmem:[#allocation5 + $0x374] sm:$0xf0] }
  0x50   :  { %913 = vmatmul.bf16.vlgmr.msrb.gmra.mxu3 %v1799_v9  ;;  %887 = vmatmul.bf16.vlgmr.msrb.gmra.mxu1 %v1799_v9  ;;  %v1391_v18 = vor.u32 %v1642_v10, %v1388_v11  ;;  %v1100_v21 = vld [vmem:[#allocation5 + $0x70] sm:$0xf0]  ;;  %v1066_v25 = vld [vmem:[#allocation5 + $0x10] sm:$0xf]  ;;  %v1236_v5 = vld [vmem:[#allocation5 + $0x178] sm:$0xf0]  ;;  %v1491_v11 = vor.u32 %v1671_v3, %v1490_v1 }
  0x51   :  { %931 = vmatpush.bf16.msra.mxu1 %v1547_v15  ;;  %957 = vmatpush.bf16.msra.mxu3 %v1551_v20  ;;  %v1098_v15 = vld [vmem:[#allocation5 + $0x50] sm:$0xf]  ;;  %v1570_v20 = vld [vmem:[#allocation5 + $0x54] sm:$0xf]  ;;  %v1667_v6 = vld [vmem:[#allocation5 + $0x35c] sm:$0xf] }
  0x52   :  { %v1634_v22 = vld [vmem:[#allocation5 + $0x254] sm:$0xf]  ;;  %v1099_v24 = vor.u32 %v1574_v16, %v1098_v15  ;;  %v1322_v29 = vld [vmem:[#allocation5 + $0x210] sm:$0xf]  ;;  %v1492_v7 = vld [vmem:[#allocation5 + $0x378] sm:$0xf0] }
  0x53   :  { %919 = vmatpush.bf16.msra.mxu0 %v1259_v26  ;;  %945 = vmatpush.bf16.msra.mxu2 %v1263_v28  ;;  %v1356_v23 = vld [vmem:[#allocation5 + $0x270] sm:$0xf0]  ;;  %v1566_v26 = vld [vmem:[#allocation5 + $0x2c] sm:$0xf0]  ;;  %v1103_v28 = vor.u32 %v1570_v20, %v1100_v21  ;;  %v1458_v15 = vld [vmem:[#allocation5 + $0x318] sm:$0xf]  ;;  %v1495_v16 = vor.u32 %v1667_v6, %v1492_v7 }
  0x54   :  { %v1630_v30 = vld [vmem:[#allocation5 + $0x22c] sm:$0xf0]  ;;  %v1562_v31 = vld [vmem:[#allocation5 + $0x14] sm:$0xf]  ;;  %v1659_v20 = vld [vmem:[#allocation5 + $0x31c] sm:$0xf] }
  0x55   :  { %932 = vmatpush.bf16.msra.mxu1 %v1515_v27  ;;  %958 = vmatpush.bf16.msra.mxu3 %v1519_v32  ;;  %v1355_v27 = vor.u32 %v1638_v19, %v1354_v17  ;;  %v1359_v32 = vor.u32 %v1634_v22, %v1356_v23  ;;  %v1068_v33 = vld [vmem:[#allocation5 + $0x30] sm:$0xf0]  ;;  %v1323_v43 = vor.u32 %v1630_v30, %v1322_v29  ;;  %v1663_v17 = vld [vmem:[#allocation5 + $0x334] sm:$0xf0]  ;;  %v1204_v19 = vld [vmem:[#allocation5 + $0x138] sm:$0xf0] }
  0x56   :  { %v1626_v34 = vld [vmem:[#allocation5 + $0x214] sm:$0xf]  ;;  %v1460_v21 = vld [vmem:[#allocation5 + $0x338] sm:$0xf0]  ;;  %v1459_v23 = vor.u32 %v1663_v17, %v1458_v15  ;;  %v1655_v29 = vld [vmem:[#allocation5 + $0x2f4] sm:$0xf0] }
  0x57   :  { %920 = vmatpush.bf16.msra.mxu0 %v1227_v38  ;;  %946 = vmatpush.bf16.msra.mxu2 %v1231_v40  ;;  %v1324_v35 = vld [vmem:[#allocation5 + $0x230] sm:$0xf0]  ;;  %v1554_v38 = vld [vmem:[#allocation5 + $0x3d8] sm:$0xf]  ;;  %v1587_v30 = vld [vmem:[#allocation5 + $0xdc] sm:$0xf] }
  0x58   :  { %v1687_v40 = vld [vmem:[#allocation5 + $0x3f4] sm:$0xf0]  ;;  %v1327_v47 = vor.u32 %v1626_v34, %v1324_v35  ;;  %v1396_v45 = vld [vmem:[#allocation5 + $0x2b8] sm:$0xf0] }
  0x59   :  { %933 = vmatpush.bf16.msra.mxu1 %v1483_v39  ;;  %959 = vmatpush.bf16.msra.mxu3 %v1487_v44  ;;  %v1067_v39 = vor.u32 %v1566_v26, %v1066_v25  ;;  %v1071_v44 = vor.u32 %v1562_v31, %v1068_v33  ;;  %v1555_v49 = vor.u32 %v1687_v40, %v1554_v38  ;;  %v1170_v25 = vld [vmem:[#allocation5 + $0xd8] sm:$0xf]  ;;  %v1172_v31 = vld [vmem:[#allocation5 + $0xf8] sm:$0xf0] }
  0x5a   :  { %v1591_v26 = vld [vmem:[#allocation5 + $0xf4] sm:$0xf0]  ;;  %v1428_v33 = vld [vmem:[#allocation5 + $0x2f8] sm:$0xf0]  ;;  %v1175_v36 = vor.u32 %v1587_v30, %v1172_v31 }
  0x5b   :  { %921 = vmatpush.bf16.msra.mxu0 %v1195_v50  ;;  %947 = vmatpush.bf16.msra.mxu2 %v1199_v52  ;;  %v1303_v50 = vor.u32 %v1619_v41, %v1300_v42  ;;  %v1615_v52 = vld [vmem:[#allocation5 + $0x1b4] sm:$0xf0]  ;;  %v1171_v34 = vor.u32 %v1591_v26, %v1170_v25  ;;  %v1579_v42 = vld [vmem:[#allocation5 + $0x9c] sm:$0xf] }
  0x5c   :  { %v1138_v37 = vld [vmem:[#allocation5 + $0x98] sm:$0xf]  ;;  %v1108_v55 = vld [vmem:[#allocation5 + $0x78] sm:$0xf0] }
  0x5d   :  { %934 = vmatpush.bf16.msra.mxu1 %v1451_v51  ;;  %960 = vmatpush.bf16.msra.mxu3 %v1455_v56  ;;  %v1266_v51 = vld [vmem:[#allocation5 + $0x198] sm:$0xf]  ;;  %v1611_v56 = vld [vmem:[#allocation5 + $0x19c] sm:$0xf] }
  0x5e   :  { %v1267_v60 = vor.u32 %v1615_v52, %v1266_v51  ;;  %v1583_v38 = vld [vmem:[#allocation5 + $0xb4] sm:$0xf0]  ;;  %v1076_v3 = vld [vmem:[#allocation5 + $0x38] sm:$0xf0] }
  0x5f   :  { %922 = vmatpush.bf16.msra.mxu0 %v1163_v62  ;;  %948 = vmatpush.bf16.msra.mxu2 %v1167_v0  ;;  %v1271_v62 = vor.u32 %v1611_v56, %v1268_v57  ;;  %v1607_v0 = vld [vmem:[#allocation5 + $0x174] sm:$0xf0]  ;;  %v1139_v46 = vor.u32 %v1583_v38, %v1138_v37  ;;  %v1635_v56 = vld [vmem:[#allocation5 + $0x25c] sm:$0xf] }
  0x60   :  { %v1647_v41 = vld [vmem:[#allocation5 + $0x2b4] sm:$0xf0]  ;;  %v1364_v57 = vld [vmem:[#allocation5 + $0x278] sm:$0xf0] }
  0x61   :  { %935 = vmatpush.bf16.msra.mxu1 %v1419_v63  ;;  %961 = vmatpush.bf16.msra.mxu3 %v1423_v4  ;;  %v1234_v63 = vld [vmem:[#allocation5 + $0x158] sm:$0xf]  ;;  %v1603_v4 = vld [vmem:[#allocation5 + $0x15c] sm:$0xf] }
  0x62   :  { %v1235_v10 = vor.u32 %v1607_v0, %v1234_v63  ;;  %v1362_v51 = vld [vmem:[#allocation5 + $0x258] sm:$0xf]  ;;  %v1367_v0 = vor.u32 %v1635_v56, %v1364_v57 }
  0x63   :  { %923 = vmatpush.bf16.msra.mxu0 %v1131_v12  ;;  %949 = vmatpush.bf16.msra.mxu2 %v1135_v14  ;;  %v1239_v12 = vor.u32 %v1603_v4, %v1236_v5  ;;  %v1599_v14 = vld [vmem:[#allocation5 + $0x134] sm:$0xf0]  ;;  %v1627_v4 = vld [vmem:[#allocation5 + $0x21c] sm:$0xf] }
  0x64   :  { %v1639_v53 = vld [vmem:[#allocation5 + $0x274] sm:$0xf0]  ;;  %v1332_v5 = vld [vmem:[#allocation5 + $0x238] sm:$0xf0] }
  0x65   :  { %936 = vmatpush.bf16.msra.mxu1 %v1387_v13  ;;  %962 = vmatpush.bf16.msra.mxu3 %v1391_v18  ;;  %v1202_v13 = vld [vmem:[#allocation5 + $0x118] sm:$0xf]  ;;  %v1595_v18 = vld [vmem:[#allocation5 + $0x11c] sm:$0xf]  ;;  %v1363_v59 = vor.u32 %v1639_v53, %v1362_v51 }
  0x66   :  { %v1203_v22 = vor.u32 %v1599_v14, %v1202_v13  ;;  %v1330_v63 = vld [vmem:[#allocation5 + $0x218] sm:$0xf] }
  0x67   :  { %924 = vmatpush.bf16.msra.mxu0 %v1099_v24  ;;  %950 = vmatpush.bf16.msra.mxu2 %v1103_v28  ;;  %v1207_v24 = vor.u32 %v1595_v18, %v1204_v19  ;;  %v1463_v28 = vor.u32 %v1659_v20, %v1460_v21  ;;  %v1631_v1 = vld [vmem:[#allocation5 + $0x234] sm:$0xf0] }
  0x68   :  { %v1331_v7 = vor.u32 %v1631_v1, %v1330_v63 }
  0x69   :  { %937 = vmatpush.bf16.msra.mxu1 %v1355_v27  ;;  %963 = vmatpush.bf16.msra.mxu3 %v1359_v32  ;;  %v1426_v27 = vld [vmem:[#allocation5 + $0x2d8] sm:$0xf]  ;;  %v1651_v32 = vld [vmem:[#allocation5 + $0x2dc] sm:$0xf] }
  0x6a   :  { %v1427_v35 = vor.u32 %v1655_v29, %v1426_v27  ;;  %v1431_v40 = vor.u32 %v1651_v32, %v1428_v33 }
  0x6b   :  { %925 = vmatpush.bf16.msra.mxu0 %v1067_v39  ;;  %951 = vmatpush.bf16.msra.mxu2 %v1071_v44  ;;  %v1394_v39 = vld [vmem:[#allocation5 + $0x298] sm:$0xf]  ;;  %v1643_v44 = vld [vmem:[#allocation5 + $0x29c] sm:$0xf] }
  0x6c   :  { %v1399_v52 = vor.u32 %v1643_v44, %v1396_v45 }
  0x6d   :  { %938 = vmatpush.bf16.msra.mxu1 %v1323_v43  ;;  %964 = vmatpush.bf16.msra.mxu3 %v1327_v47  ;;  %v1140_v43 = vld [vmem:[#allocation5 + $0xb8] sm:$0xf0]  ;;  %v1395_v47 = vor.u32 %v1647_v41, %v1394_v39 }
  0x6e   :  { %952 = vmatmul.bf16.vlgmr.msra.gmra.mxu2 %v1797_v8  ;;  %926 = vmatmul.bf16.vlgmr.msra.gmra.mxu0 %v1797_v8 }
  0x6f   :  { %970 = vmatpush.bf16.msrb.mxu0 %v1299_v48  ;;  %996 = vmatpush.bf16.msrb.mxu2 %v1303_v50  ;;  %v1143_v48 = vor.u32 %v1579_v42, %v1140_v43  ;;  %v1575_v50 = vld [vmem:[#allocation5 + $0x74] sm:$0xf0] }
  0x70   :  { %965 = vmatmul.bf16.vlgmr.msra.gmra.mxu3 %v1799_v9  ;;  %939 = vmatmul.bf16.vlgmr.msra.gmra.mxu1 %v1799_v9 }
  0x71   :  { %983 = vmatpush.bf16.msrb.mxu1 %v1555_v49  ;;  %1009 = vmatpush.bf16.msrb.mxu3 %v1559_v54  ;;  %v1106_v49 = vld [vmem:[#allocation5 + $0x58] sm:$0xf]  ;;  %v1571_v54 = vld [vmem:[#allocation5 + $0x5c] sm:$0xf] }
  0x72   :  { %v1107_v58 = vor.u32 %v1575_v50, %v1106_v49 }
  0x73   :  { %971 = vmatpush.bf16.msrb.mxu0 %v1267_v60  ;;  %997 = vmatpush.bf16.msrb.mxu2 %v1271_v62  ;;  %v1111_v60 = vor.u32 %v1571_v54, %v1108_v55  ;;  %v1567_v62 = vld [vmem:[#allocation5 + $0x34] sm:$0xf0] }
  0x75   :  { %984 = vmatpush.bf16.msrb.mxu1 %v1523_v61  ;;  %1010 = vmatpush.bf16.msrb.mxu3 %v1527_v2  ;;  %v1074_v61 = vld [vmem:[#allocation5 + $0x18] sm:$0xf]  ;;  %v1563_v2 = vld [vmem:[#allocation5 + $0x1c] sm:$0xf] }
  0x76   :  { %v1075_v6 = vor.u32 %v1567_v62, %v1074_v61 }
  0x77   :  { %972 = vmatpush.bf16.msrb.mxu0 %v1235_v10  ;;  %998 = vmatpush.bf16.msrb.mxu2 %v1239_v12  ;;  %v1079_v10 = vor.u32 %v1563_v2, %v1076_v3 }
  0x79   :  { %985 = vmatpush.bf16.msrb.mxu1 %v1491_v11  ;;  %1011 = vmatpush.bf16.msrb.mxu3 %v1495_v16  ;;  %v1335_v11 = vor.u32 %v1627_v4, %v1332_v5 }
  0x7b   :  { %973 = vmatpush.bf16.msrb.mxu0 %v1203_v22  ;;  %999 = vmatpush.bf16.msrb.mxu2 %v1207_v24 }
  0x7d   :  { %986 = vmatpush.bf16.msrb.mxu1 %v1459_v23  ;;  %1012 = vmatpush.bf16.msrb.mxu3 %v1463_v28 }
  0x7f   :  { %974 = vmatpush.bf16.msrb.mxu0 %v1171_v34  ;;  %1000 = vmatpush.bf16.msrb.mxu2 %v1175_v36 }
  0x81   :  { %987 = vmatpush.bf16.msrb.mxu1 %v1427_v35  ;;  %1013 = vmatpush.bf16.msrb.mxu3 %v1431_v40 }
  0x83   :  { %975 = vmatpush.bf16.msrb.mxu0 %v1139_v46  ;;  %1001 = vmatpush.bf16.msrb.mxu2 %v1143_v48 }
  0x85   :  { %988 = vmatpush.bf16.msrb.mxu1 %v1395_v47  ;;  %1014 = vmatpush.bf16.msrb.mxu3 %v1399_v52 }
  0x87   :  { %976 = vmatpush.bf16.msrb.mxu0 %v1107_v58  ;;  %1002 = vmatpush.bf16.msrb.mxu2 %v1111_v60 }
  0x89   :  { %989 = vmatpush.bf16.msrb.mxu1 %v1363_v59  ;;  %1015 = vmatpush.bf16.msrb.mxu3 %v1367_v0 }
  0x8b   :  { %977 = vmatpush.bf16.msrb.mxu0 %v1075_v6  ;;  %1003 = vmatpush.bf16.msrb.mxu2 %v1079_v10 }
  0x8d   :  { %990 = vmatpush.bf16.msrb.mxu1 %v1331_v7  ;;  %1016 = vmatpush.bf16.msrb.mxu3 %v1335_v11 }
  0x8e   :  { %978 = vmatmul.bf16.vlgmr.msrb.gmra.mxu0 %v1797_v8  ;;  %1004 = vmatmul.bf16.vlgmr.msrb.gmra.mxu2 %v1797_v8 }
  0x90   :  { %991 = vmatmul.bf16.vlgmr.msrb.gmra.mxu1 %v1799_v9  ;;  %1017 = vmatmul.bf16.vlgmr.msrb.gmra.mxu3 %v1799_v9 }
  0xab   :  { %v823_v13 = vpop.f32.mrf.mxu0 }
  0xad   :  { %v836_v12 = vpop.f32.mrf.mxu1 }
  0xae   :  { %v837_v14 = vadd.f32 %v836_v12, %v823_v13 }
  0xb0   :  { %1022 = vst [vmem:[#allocation7] sm:$0xff] %v837_v14 }
  0xb1   :  { %v849_v15 = vpop.f32.mrf.mxu2 }
  0xb3   :  { %v862_v16 = vpop.f32.mrf.mxu3  ;;  %v825_v19 = vpop.f32.mrf.mxu0 }
  0xb4   :  { %v863_v17 = vadd.f32 %v862_v16, %v849_v15 }
  0xb5   :  { %v838_v18 = vpop.f32.mrf.mxu1 }
  0xb6   :  { %1023 = vst [vmem:[#allocation7 + $0x8] sm:$0xff] %v863_v17 }
  0xb9   :  { %v851_v20 = vpop.f32.mrf.mxu2 }
  0xbb   :  { %v864_v21 = vpop.f32.mrf.mxu3 }
  0xcb   :  { %v875_v22 = vpop.f32.mrf.mxu0 }
  0xcd   :  { %v888_v23 = vpop.f32.mrf.mxu1 }
  0xce   :  { %v889_v24 = vadd.f32 %v888_v23, %v875_v22 }
  0xd0   :  { %1024 = vst [vmem:[#allocation7 + $0x10] sm:$0xff] %v889_v24 }
  0xd1   :  { %v901_v25 = vpop.f32.mrf.mxu2 }
  0xd3   :  { %v914_v8 = vpop.f32.mrf.mxu3  ;;  %v877_v9 = vpop.f32.mrf.mxu0 }
  0xd4   :  { %v915_v26 = vadd.f32 %v914_v8, %v901_v25 }
  0xd5   :  { %v890_v27 = vpop.f32.mrf.mxu1 }
  0xd6   :  { %1025 = vst [vmem:[#allocation7 + $0x18] sm:$0xff] %v915_v26 }
  0xd9   :  { %v903_v28 = vpop.f32.mrf.mxu2 }
  0xdb   :  { %v916_v29 = vpop.f32.mrf.mxu3 }
  0xeb   :  { %v927_v30 = vpop.f32.mrf.mxu0 }
  0xed   :  { %v940_v31 = vpop.f32.mrf.mxu1 }
  0xee   :  { %v941_v32 = vadd.f32 %v940_v31, %v927_v30 }
  0xf0   :  { %1026 = vst [vmem:[#allocation7 + $0x20] sm:$0xff] %v941_v32 }
  0xf1   :  { %v953_v33 = vpop.f32.mrf.mxu2 }
  0xf3   :  { %v966_v34 = vpop.f32.mrf.mxu3  ;;  %v929_v36 = vpop.f32.mrf.mxu0 }
  0xf4   :  { %v967_v35 = vadd.f32 %v966_v34, %v953_v33 }
  0xf5   :  { %v942_v37 = vpop.f32.mrf.mxu1 }
  0xf6   :  { %1027 = vst [vmem:[#allocation7 + $0x28] sm:$0xff] %v967_v35 }
  0xf9   :  { %v955_v38 = vpop.f32.mrf.mxu2 }
  0xfb   :  { %v968_v39 = vpop.f32.mrf.mxu3 }
 0x10b   :  { %v979_v40 = vpop.f32.mrf.mxu0 }
 0x10d   :  { %v992_v41 = vpop.f32.mrf.mxu1 }
 0x10e   :  { %v993_v42 = vadd.f32 %v992_v41, %v979_v40 }
 0x110   :  { %1028 = vst [vmem:[#allocation7 + $0x30] sm:$0xff] %v993_v42 }
 0x111   :  { %v1005_v43 = vpop.f32.mrf.mxu2 }
 0x113   :  { %v1018_v44 = vpop.f32.mrf.mxu3  ;;  %v981_v45 = vpop.f32.mrf.mxu0 }
 0x114   :  { %v1019_v46 = vadd.f32 %v1018_v44, %v1005_v43 }
 0x115   :  { %v994_v47 = vpop.f32.mrf.mxu1 }
 0x116   :  { %1029 = vst [vmem:[#allocation7 + $0x38] sm:$0xff] %v1019_v46 }
 0x117   :  { %1040 = dma.vmem_to_hbm [thread:$0]  %s1036_s1, 1024, %s1038_s23, [#allocation4]  }
 0x119   :  { %v1007_v48 = vpop.f32.mrf.mxu2 }
 0x11b   :  { %v1020_v49 = vpop.f32.mrf.mxu3 }
 0x11c   :  { %1769 = dma.done.wait [#allocation4], 1024  }
 0x11d   :  { %1770 = vsyncadd [#allocation4], 4294966272 }
 0x11e   :  { %1045 = vsyncpa [#allocation3], 1 }
 0x11f   :  { %1046 = vsyncpa [#allocation6], 1 }
 0x120   :  { %1047 = vsyncpa [#allocation4], 1 }

</bundles_post_ra>
